<compile_context>
chip_gen: v7x
topology: tpu7x:2x2x1
jax: 0.10.0
libtpu: 0.0.40
codegen_flags: <defaults>
</compile_context>

<pallas_src>
import jax
import jax.numpy as jnp
from jax.experimental import pallas as pl
from jax.experimental.pallas import tpu as pltpu

_LANE_MIN = 128
_TARGET_BLOCK_BYTES = 4 * 1024 * 1024      # ~4 MiB blocks: past the roofline knee.
_SINGLE_BLOCK_MAX_BYTES = 1 * 1024 * 1024  # above this, force >= 2 grid steps (v7x: 2 TCs).
_VMEM_LIMIT_BYTES = 32 * 1024 * 1024       # 16 MiB live buffers + headroom; safe on v5e/v6e/v7x.


def _sigmoid_kernel(x_ref, o_ref):
    # sigmoid(x) = 0.5 * tanh(0.5 * x) + 0.5
    # One transcendental per element on the EUP; mul/add on the VALU.  Exact
    # (no exp overflow path), so outputs match jax.nn.sigmoid to f32 noise.
    x = x_ref[...].astype(jnp.float32)
    o_ref[...] = (0.5 * jnp.tanh(0.5 * x) + 0.5).astype(o_ref.dtype)


def _sublane_for(dtype) -> int:
    # Sub-32-bit dtypes pack along sublanes: 8 rows f32, 16 bf16, 32 int8/fp8.
    itemsize = jnp.dtype(dtype).itemsize
    return max(8, 32 // max(itemsize, 1))


def _round_up(a: int, m: int) -> int:
    return ((a + m - 1) // m) * m


def _pallas_sigmoid_call(arr, block_shape, grid, index_map):
    return pl.pallas_call(
        _sigmoid_kernel,
        out_shape=jax.ShapeDtypeStruct(arr.shape, arr.dtype),
        grid_spec=pltpu.PrefetchScalarGridSpec(
            num_scalar_prefetch=0,
            grid=grid,
            in_specs=[pl.BlockSpec(block_shape, index_map)],
            out_specs=pl.BlockSpec(block_shape, index_map),
        ),
        compiler_params=pltpu.CompilerParams(
            dimension_semantics=("parallel",),
            vmem_limit_bytes=_VMEM_LIMIT_BYTES,
        ),
    )(arr)


def _run_slab_2d(slab: jax.Array) -> jax.Array:
    """Sigmoid over a 2-D (rows, lane) slab whose last dim is a 128-multiple."""
    rows, lane = slab.shape
    itemsize = jnp.dtype(slab.dtype).itemsize
    sublane = _sublane_for(slab.dtype)
    total_bytes = rows * lane * itemsize

    if total_bytes <= _SINGLE_BLOCK_MAX_BYTES:
        # Tiny input: one block, one grid step.
        block_rows = rows
    else:
        target_rows = max(
            sublane, (_TARGET_BLOCK_BYTES // (lane * itemsize)) // sublane * sublane
        )
        # Cap at ceil(rows/2) (sublane-rounded) so the grid always has >= 2
        # steps: the "parallel" axis then shards across both v7x TensorCores.
        half_rows = _round_up((rows + 1) // 2, sublane)
        block_rows = max(sublane, min(target_rows, half_rows))

    grid = (pl.cdiv(rows, block_rows),)
    return _pallas_sigmoid_call(slab, (block_rows, lane), grid, lambda i: (i, 0))


def _run_flat_1d(flat: jax.Array) -> jax.Array:
    """Sigmoid directly over a ragged flat 1-D array (no pad / slice passes)."""
    (n,) = flat.shape
    itemsize = jnp.dtype(flat.dtype).itemsize
    tile = _sublane_for(flat.dtype) * _LANE_MIN  # native tile in elements (1024 for f32)
    total_bytes = n * itemsize

    if total_bytes <= _SINGLE_BLOCK_MAX_BYTES:
        # Block == full array dim: exempt from the 128-divisibility rule, so
        # any ragged size works in one grid step with zero extra HBM traffic.
        block = n
    else:
        # Large ragged arrays: lane-multiple blocks with a cdiv grid; Pallas
        # masks the partial last block, so no pad/slice HBM passes are paid.
        target = max(tile, (_TARGET_BLOCK_BYTES // itemsize) // tile * tile)
        half = _round_up((n + 1) // 2, tile)
        block = max(tile, min(target, half))

    grid = (pl.cdiv(n, block),)
    return _pallas_sigmoid_call(flat, (block,), grid, lambda i: (i,))


def sigmoid_pallas(x: jax.Array) -> jax.Array:
    """Applies sigmoid elementwise via a Pallas TPU kernel. Preserves shape/dtype."""
    orig_shape = x.shape
    n = x.size
    if n == 0:
        return x
    flat = x.reshape(-1)

    # Prefer the widest lane-multiple last dim that divides n exactly: the
    # reshape is free (no HBM pass) and rows per DMA descriptor are fat.
    lane = 0
    for cand in (1024, 512, 256, 128):
        if n % cand == 0:
            lane = cand
            break

    if lane:
        out = _run_slab_2d(flat.reshape(n // lane, lane))
    else:
        out = _run_flat_1d(flat)
    return out.reshape(orig_shape)


class ReLu:
    """Mirrors the PyTorch module: __init__ stores nn.Sigmoid, forward applies it."""

    def __init__(self):
        # No parameters — nn.Sigmoid() is parameter-free.
        pass

    def __call__(self, x):
        return sigmoid_pallas(x)


if __name__ == "__main__":
    key = jax.random.PRNGKey(0)
    # Input consistent with the script: a tensor reshaped to (-1, 1, 2, 2) NCHW.
    raw = jax.random.normal(key, (2, 4, 16, 16), dtype=jnp.float32)
    inp = jnp.reshape(raw, (-1, 1, 2, 2))  # shape (512, 1, 2, 2)

    relu = ReLu()
    out = jax.block_until_ready(relu(inp))
    ref = jax.nn.sigmoid(inp)
    assert out.shape == inp.shape and out.dtype == inp.dtype
    assert jnp.allclose(out, ref, atol=1e-5, rtol=1e-5), "mismatch vs reference sigmoid"

    # Multi-block 2-D path: 8 MiB f32 -> 2 grid steps of ~4 MiB lane-dense blocks
    # (also exercises the >=2-step cap for v7x's two TensorCores).
    big = jax.random.normal(jax.random.PRNGKey(1), (8, 32, 64, 128), dtype=jnp.float32)
    out_big = jax.block_until_ready(relu(big))
    assert jnp.allclose(out_big, jax.nn.sigmoid(big), atol=1e-5, rtol=1e-5)

    # Ragged (non-128-multiple) path: single full-array 1-D block, no pad/slice.
    ragged = jax.random.normal(jax.random.PRNGKey(2), (3, 5, 7, 11), dtype=jnp.float32)
    out_rag = jax.block_until_ready(relu(ragged))
    assert out_rag.shape == ragged.shape
    assert jnp.allclose(out_rag, jax.nn.sigmoid(ragged), atol=1e-5, rtol=1e-5)

    print("KERNEL_OK")
</pallas_src>

<mosaic_0001>
module attributes {stable_mosaic.version = 11 : i64} {
  func.func @_sigmoid_kernel(%arg0: i32, %arg1: memref<2x1024xf32, #tpu.memory_space<vmem>>, %arg2: memref<2x1024xf32, #tpu.memory_space<vmem>>) attributes {dimension_semantics = [#tpu.dimension_semantics<parallel>], iteration_bounds = array<i64: 1>, scalar_prefetch = 0 : i64, scratch_operands = 0 : i64, tpu.core_type = #tpu.core_type<tc>, window_params = [{transform_indices = @transform_0, window_bounds = array<i64: 2, 1024>}, {transform_indices = @transform_1, window_bounds = array<i64: 2, 1024>}]} {
    %c0 = arith.constant 0 : index
    %c0_0 = arith.constant 0 : index
    %0 = vector.load %arg1[%c0, %c0_0] : memref<2x1024xf32, #tpu.memory_space<vmem>>, vector<2x1024xf32>
    %cst = arith.constant 5.000000e-01 : f32
    %1 = vector.broadcast %cst : f32 to vector<2x1024xf32>
    %2 = arith.mulf %1, %0 : vector<2x1024xf32>
    %3 = math.tanh %2 : vector<2x1024xf32>
    %cst_1 = arith.constant 5.000000e-01 : f32
    %4 = vector.broadcast %cst_1 : f32 to vector<2x1024xf32>
    %5 = arith.mulf %4, %3 : vector<2x1024xf32>
    %cst_2 = arith.constant 5.000000e-01 : f32
    %6 = vector.broadcast %cst_2 : f32 to vector<2x1024xf32>
    %7 = arith.addf %5, %6 : vector<2x1024xf32>
    %c0_3 = arith.constant 0 : index
    %c0_4 = arith.constant 0 : index
    %8 = vector.load %arg2[%c0_3, %c0_4] : memref<2x1024xf32, #tpu.memory_space<vmem>>, vector<2x1024xf32>
    tpu.vector_store %arg2[%c0_3, %c0_4], %7 {strides = array<i32>} : memref<2x1024xf32, #tpu.memory_space<vmem>>, vector<2x1024xf32>,
    return
  }
  func.func @transform_0(%arg0: i32) -> (i32, i32) {
    %c0_i32 = arith.constant 0 : i32
    %c0_i32_0 = arith.constant 0 : i32
    return %arg0, %c0_i32 : i32, i32
  }
  func.func @transform_1(%arg0: i32) -> (i32, i32) {
    %c0_i32 = arith.constant 0 : i32
    %c0_i32_0 = arith.constant 0 : i32
    return %arg0, %c0_i32 : i32, i32
  }
}

</mosaic_0001>

<bundles_post_ra>
// kernel: tpu_custom_call.1
= control target key start
LH: loop header
LB: loop body
LE: loop exit
PB: predicated region body
PF: predicated region fallthrough
CT: control target
= control target key end

     0   :  { %6 = vsyncpa [#allocation3], 0  ;;  %s138_s0 = inlined_call_operand.hbm [shape: f32[2,1024], index: 0, kind: input, shape index: {}]   ;;  %s139_s1 = inlined_call_operand.hbm [shape: f32[2,1024], index: 1, kind: output, shape index: {}]  }
   0x1   :  { %7 = vsyncpa [#allocation4], 0  ;;  %s102_s6 = smov [#allocation2]   ;;  %s54_s10 = scalar_lea.hbm %s138_s0, 256 }
   0x2   :  { %s14_s7 = sshll.u32 %s102_s6, 4  ;;  %p55_p0 = scmp.ne.s32.totalorder %s138_s0, %s54_s10  ;;  %s15_s7 = int_to_ptr.vmem [resolvable:$true] %s14_s7 }
   0x3   :  { %p58_p1 = scmp.lt.u32.totalorder %s54_s10, %s138_s0 }
   0x5   :  { %p60_p2 = pnand %p58_p1, %p55_p0 }
   0x7   :  { %63 = shalt.err (!%p60_p2)
}
   0x8   :  { %s64_s15 = scalar_lea.vmem %s15_s7, 256  ;;  %p69_p4 = scmp.lt.s32.totalorder %s15_s7, %s15_s7 }
   0x9   :  { %p65_p3 = scmp.ne.s32.totalorder %s15_s7, %s64_s15  ;;  %p70_p5 = scmp.lt.s32.totalorder %s64_s15, %s64_s15 }
   0xb   :  { %p71_p6 = por %p70_p5, %p69_p4 }
   0xd   :  { %p72_p7 = pnand %p71_p6, %p65_p3 }
   0xf   :  { %75 = shalt.err (!%p72_p7)
}
  0x10   :  { %17 = dma.hbm_to_vmem [thread:$0]  %s138_s0, 256, %s15_s7, [#allocation3]  }
  0x11   :  { %98 = dma.done.wait [#allocation3], 256  }
  0x12   :  { %99 = vsyncadd [#allocation3], 4294967040  ;;  %v21_v0 = vld [vmem:[#allocation2] sm:$0xff]  ;;  %v22_v1 = vld [vmem:[#allocation2 + $0x8] sm:$0xff]  ;;  %s103_s18 = smov [#allocation5]  }
  0x13   :  { %v23_v2 = vmul.f32 0.5, %v21_v0  ;;  %v24_v3 = vmul.f32 0.5, %v22_v1  ;;  %s39_s19 = sshll.u32 %s103_s18, 4  ;;  %s40_s19 = int_to_ptr.vmem [resolvable:$true] %s39_s19 }
  0x14   :  { %s76_s0 = scalar_lea.vmem %s40_s19, 256  ;;  %p81_p9 = scmp.lt.s32.totalorder %s40_s19, %s40_s19 }
  0x15   :  { %50 = vtanh.f32 %v23_v2  ;;  %p77_p8 = scmp.ne.s32.totalorder %s40_s19, %s76_s0  ;;  %p82_p10 = scmp.lt.s32.totalorder %s76_s0, %s76_s0 }
  0x16   :  { %52 = vtanh.f32 %v24_v3 }
  0x17   :  { %p83_p11 = por %p82_p10, %p81_p9 }
  0x19   :  { %p84_p12 = pnand %p83_p11, %p77_p8 }
  0x1f   :  { %v51_v4 = vpop.eup %50 }
  0x20   :  { %v53_v5 = vpop.eup %52  ;;  %v27_v6 = vmul.f32 0.5, %v51_v4 }
  0x21   :  { %v28_v7 = vmul.f32 0.5, %v53_v5 }
  0x22   :  { %v29_v8 = vadd.f32 0.5, %v27_v6 }
  0x23   :  { %v30_v9 = vadd.f32 0.5, %v28_v7 }
  0x24   :  { %31 = vst [vmem:[#allocation5] sm:$0xff] %v29_v8 }
  0x25   :  { %32 = vst [vmem:[#allocation5 + $0x8] sm:$0xff] %v30_v9 }
  0x26   :  { %87 = shalt.err (!%p84_p12)
}
  0x27   :  { %s88_s22 = scalar_lea.hbm %s139_s1, 256 }
  0x28   :  { %p89_p13 = scmp.ne.s32.totalorder %s139_s1, %s88_s22  ;;  %p92_p0 = scmp.lt.u32.totalorder %s88_s22, %s139_s1 }
  0x2a   :  { %p94_p1 = pnand %p92_p0, %p89_p13 }
  0x2c   :  { %97 = shalt.err (!%p94_p1)
}
  0x2d   :  { %42 = dma.vmem_to_hbm [thread:$0]  %s40_s19, 256, %s139_s1, [#allocation4]  }
  0x2e   :  { %100 = dma.done.wait [#allocation4], 256  }
  0x2f   :  { %101 = vsyncadd [#allocation4], 4294967040 }
  0x30   :  { %46 = vsyncpa [#allocation3], 1 }
  0x31   :  { %47 = vsyncpa [#allocation4], 1 }

</bundles_post_ra>
